<compile_context>
chip_gen: v5e
topology: v5e:2x2
jax: 0.10.0
libtpu: 0.0.40
codegen_flags: <defaults>
</compile_context>

<pallas_src>
import jax
import jax.numpy as jnp
from jax.experimental import pallas as pl
from jax.experimental.pallas import tpu as pltpu


def merge_layer_kernel(x_ref, w1_ref, b1_ref, w2_ref, b2_ref, o_ref, acc_ref):
    j = pl.program_id(1)

    @pl.when(j == 0)
    def _init():
        acc_ref[...] = jnp.zeros_like(acc_ref)

    # fc1 d2-slice: bf16 x bf16 on the MXU, f32 accumulate, f32 bias + ReLU.
    x_bf = x_ref[...].astype(jnp.bfloat16)
    h = jnp.dot(x_bf, w1_ref[...], preferred_element_type=jnp.float32)
    h = jnp.maximum(h + b1_ref[...], 0.0)

    # fc2 partial product for this d2-slice, accumulated in f32.
    acc_ref[...] += jnp.dot(h.astype(jnp.bfloat16), w2_ref[...],
                            preferred_element_type=jnp.float32)

    @pl.when(j == pl.num_programs(1) - 1)
    def _finalize():
        o_ref[...] = jnp.maximum(acc_ref[...] + b2_ref[...], 0.0).astype(o_ref.dtype)


def _round_up(n, m):
    return ((n + m - 1) // m) * m


def _vmem_capacity_bytes():
    try:
        return int(pltpu.get_tpu_info().vmem_capacity_bytes)
    except Exception:
        return 64 * 1024 * 1024  # conservative default (v7x per-TensorCore)


def _choose_tiles(Bp, d1p, d2p, d3p, vmem_budget):
    """Pick (tile_b, tile_d2) so weights + streamed blocks + h fit the budget."""

    def weight_bytes(td2):
        # bf16 weights + f32 biases, x2 for the pipeline's default double
        # buffering (see TODO at top about Buffered(1)).
        return 2 * ((d1p * td2 + td2 * d3p) * 2 + (td2 + d3p) * 4)

    # Largest d2 tile (multiple of 128, exact divisor of d2p) whose weights fit
    # in ~45% of the budget; exact divisor keeps the reduction axis un-ragged.
    n128 = d2p // 128
    tile_d2 = 128
    for m in range(n128, 0, -1):
        if n128 % m == 0 and weight_bytes(128 * m) <= 0.45 * vmem_budget:
            tile_d2 = 128 * m
            break

    # Per-batch-row VMEM: double-buffered x (<=f32) and out (f32) blocks, the
    # f32 accumulator scratch, and the f32 h tile plus its bf16 copy.
    bytes_per_row = 8 * d1p + 12 * d3p + 6 * tile_d2
    remaining = vmem_budget - weight_bytes(tile_d2) - 2 * 1024 * 1024
    cap = max(8, (remaining // bytes_per_row) // 8 * 8)
    tile_b = max(8, min(1024, cap, Bp) // 8 * 8)

    # Guarantee >= 2 batch-grid steps so the "parallel" axis can feed both
    # TensorCores on v7x.
    while -(-Bp // tile_b) < 2 and tile_b > 8:
        tile_b = max(8, _round_up(tile_b // 2, 8))
    return tile_b, tile_d2


def prepare_merge_layer_params(params):
    """One-time prep: transpose to (in, out), zero-pad feature dims to
    multiples of 128, cast weights to bf16 (MXU-native); biases stay f32."""
    w1, b1, w2, b2 = params          # torch convention: w is (out, in)
    d2, d1 = w1.shape
    d3 = w2.shape[0]
    d1p, d2p, d3p = (_round_up(d, 128) for d in (d1, d2, d3))

    w1t = jnp.zeros((d1p, d2p), jnp.bfloat16).at[:d1, :d2].set(
        w1.T.astype(jnp.bfloat16))
    w2t = jnp.zeros((d2p, d3p), jnp.bfloat16).at[:d2, :d3].set(
        w2.T.astype(jnp.bfloat16))
    b1p = jnp.zeros((1, d2p), jnp.float32).at[:, :d2].set(
        b1.reshape(1, -1).astype(jnp.float32))
    b2p = jnp.zeros((1, d3p), jnp.float32).at[:, :d3].set(
        b2.reshape(1, -1).astype(jnp.float32))
    return dict(w1t=w1t, b1=b1p, w2t=w2t, b2=b2p,
                dims=(d1, d2, d3), padded=(d1p, d2p, d3p))


def merge_layer_forward(x, prep, *, tile_b=None, tile_d2=None):
    """x: (B, dim1) float. Returns (B, dim3) float32 = relu(fc2(relu(fc1(x))))."""
    d1, d2, d3 = prep["dims"]
    d1p, d2p, d3p = prep["padded"]
    w1t, b1p, w2t, b2p = prep["w1t"], prep["b1"], prep["w2t"], prep["b2"]

    B = x.shape[0]
    assert x.shape[1] == d1

    # Pad the batch only to a sublane multiple (8); features to d1p.  Skip the
    # HBM round trip entirely when x is already well-shaped.
    Bp = max(8, _round_up(B, 8))
    if d1 == d1p and Bp == B and x.dtype in (jnp.float32, jnp.bfloat16):
        xp = x
    else:
        # A copy is unavoidable -> make it bf16 to halve the write + kernel read.
        xp = jnp.zeros((Bp, d1p), jnp.bfloat16).at[:B, :d1].set(
            x.astype(jnp.bfloat16))

    capacity = _vmem_capacity_bytes()
    budget = capacity * 3 // 4          # leave headroom for Mosaic scratch
    auto_b, auto_d2 = _choose_tiles(Bp, d1p, d2p, d3p, budget)
    tile_b = auto_b if tile_b is None else tile_b
    tile_d2 = auto_d2 if tile_d2 is None else tile_d2
    assert tile_b % 8 == 0
    assert tile_d2 % 128 == 0 and d2p % tile_d2 == 0

    nb = -(-Bp // tile_b)               # ragged last batch block is masked
    nj = d2p // tile_d2                 # reduction axis last in the grid

    out = pl.pallas_call(
        merge_layer_kernel,
        out_shape=jax.ShapeDtypeStruct((Bp, d3p), jnp.float32),
        grid=(nb, nj),
        in_specs=[
            pl.BlockSpec((tile_b, d1p), lambda i, j: (i, 0)),   # x tile (revisited over j)
            pl.BlockSpec((d1p, tile_d2), lambda i, j: (0, j)),  # w1^T d2-slice (bf16)
            pl.BlockSpec((1, tile_d2), lambda i, j: (0, j)),    # b1 d2-slice (f32)
            pl.BlockSpec((tile_d2, d3p), lambda i, j: (j, 0)),  # w2^T d2-slice (bf16)
            pl.BlockSpec((1, d3p), lambda i, j: (0, 0)),        # b2 (resident, f32)
        ],
        out_specs=pl.BlockSpec((tile_b, d3p), lambda i, j: (i, 0)),
        scratch_shapes=[pltpu.VMEM((tile_b, d3p), jnp.float32)],
        compiler_params=pltpu.CompilerParams(
            dimension_semantics=("parallel", "arbitrary"),
            vmem_limit_bytes=int(budget),
        ),
    )(xp, w1t, b1p, w2t, b2p)

    return out[:B, :d3]


def init_params(key, dim1, dim2, dim3):
    """Deterministic init mimicking the torch module (xavier_normal_ weights,
    default Linear uniform biases)."""
    def xavier_normal(k, out_f, in_f):
        std = jnp.sqrt(2.0 / float(in_f + out_f))
        return std * jax.random.normal(k, (out_f, in_f), jnp.float32)

    def bias(k, in_f, out_f):
        bound = 1.0 / jnp.sqrt(float(in_f))
        return jax.random.uniform(k, (out_f,), jnp.float32, -bound, bound)

    k1, k2, k3, k4 = jax.random.split(key, 4)
    w1 = xavier_normal(k1, dim2, dim1)
    b1 = bias(k2, dim1, dim2)
    w2 = xavier_normal(k3, dim3, dim2)
    b2 = bias(k4, dim2, dim3)
    return (w1, b1, w2, b2)


def reference_forward(x, params):
    w1, b1, w2, b2 = params
    h = jnp.maximum(x @ w1.T + b1, 0.0)
    return jnp.maximum(h @ w2.T + b2, 0.0)


if __name__ == "__main__":
    key = jax.random.PRNGKey(0)
    k_x1, k_p1, k_x2, k_p2 = jax.random.split(key, 4)

    # Case 1: MergeLayer_1(32, 80, 16), batch 10 (exercises batch/feature pad).
    B1, d1, d2, d3 = 10, 32, 80, 16
    x1 = jax.random.normal(k_x1, (B1, d1), jnp.float32)
    p1 = init_params(k_p1, d1, d2, d3)
    prep1 = prepare_merge_layer_params(p1)
    y1 = merge_layer_forward(x1, prep1)
    jax.block_until_ready(y1)
    r1 = reference_forward(x1, p1)
    assert y1.shape == (B1, d3), y1.shape
    assert jnp.allclose(y1, r1, atol=2e-2, rtol=2e-2)

    # Case 2: MergeLayer_1(64, 256, 96), batch 20 — forces the d2-streaming
    # accumulator path (nj=2) and a ragged final batch tile (Bp=24, tile_b=16).
    B2, e1, e2, e3 = 20, 64, 256, 96
    x2 = jax.random.normal(k_x2, (B2, e1), jnp.float32)
    p2 = init_params(k_p2, e1, e2, e3)
    prep2 = prepare_merge_layer_params(p2)
    y2 = merge_layer_forward(x2, prep2, tile_b=16, tile_d2=128)
    jax.block_until_ready(y2)
    r2 = reference_forward(x2, p2)
    assert y2.shape == (B2, e3), y2.shape
    assert jnp.allclose(y2, r2, atol=2e-2, rtol=2e-2)

    print("KERNEL_OK")
</pallas_src>

<mosaic_0001>
module attributes {stable_mosaic.version = 11 : i64} {
  func.func @merge_layer_kernel(%arg0: i32, %arg1: i32, %arg2: memref<8x128xbf16, #tpu.memory_space<vmem>>, %arg3: memref<128x128xbf16, #tpu.memory_space<vmem>>, %arg4: memref<1x128xf32, #tpu.memory_space<vmem>>, %arg5: memref<128x128xbf16, #tpu.memory_space<vmem>>, %arg6: memref<1x128xf32, #tpu.memory_space<vmem>>, %arg7: memref<8x128xf32, #tpu.memory_space<vmem>>, %arg8: memref<8x128xf32, #tpu.memory_space<vmem>>) attributes {dimension_semantics = [#tpu.dimension_semantics<parallel>, #tpu.dimension_semantics<arbitrary>], iteration_bounds = array<i64: 2, 1>, scalar_prefetch = 0 : i64, scratch_operands = 1 : i64, tpu.core_type = #tpu.core_type<tc>, window_params = [{transform_indices = @transform_0, window_bounds = array<i64: 8, 128>}, {transform_indices = @transform_1, window_bounds = array<i64: 128, 128>}, {transform_indices = @transform_2, window_bounds = array<i64: 1, 128>}, {transform_indices = @transform_3, window_bounds = array<i64: 128, 128>}, {pipeline_mode = #tpu.pipeline_mode<synchronous>, transform_indices = @transform_4, window_bounds = array<i64: 1, 128>}, {transform_indices = @transform_5, window_bounds = array<i64: 8, 128>}]} {
    %c0_i32 = arith.constant 0 : i32
    %0 = arith.cmpi eq, %arg1, %c0_i32 : i32
    %1 = arith.extui %0 : i1 to i32
    %c0_i32_0 = arith.constant 0 : i32
    %2 = arith.cmpi ne, %1, %c0_i32_0 : i32
    scf.if %2 {
      %cst_16 = arith.constant 0.000000e+00 : f32
      %20 = vector.broadcast %cst_16 : f32 to vector<8x128xf32>
      %c0_17 = arith.constant 0 : index
      %c0_18 = arith.constant 0 : index
      %21 = vector.load %arg8[%c0_17, %c0_18] : memref<8x128xf32, #tpu.memory_space<vmem>>, vector<8x128xf32>
      tpu.vector_store %arg8[%c0_17, %c0_18], %20 {strides = array<i32>} : memref<8x128xf32, #tpu.memory_space<vmem>>, vector<8x128xf32>,
    } else {
    }
    %c0 = arith.constant 0 : index
    %c0_1 = arith.constant 0 : index
    %3 = vector.load %arg2[%c0, %c0_1] : memref<8x128xbf16, #tpu.memory_space<vmem>>, vector<8x128xbf16>
    %c0_2 = arith.constant 0 : index
    %c0_3 = arith.constant 0 : index
    %4 = vector.load %arg3[%c0_2, %c0_3] : memref<128x128xbf16, #tpu.memory_space<vmem>>, vector<128x128xbf16>
    %cst = arith.constant dense<0.000000e+00> : vector<8x128xf32>
    %5 = tpu.matmul %3, %4, %cst {dimension_numbers = #tpu.dot_dimension_numbers<[1], [0], [0], [1], [0, 0, 1, 1], [], []>} : vector<8x128xbf16>, vector<128x128xbf16>, vector<8x128xf32> -> vector<8x128xf32>
    %c0_4 = arith.constant 0 : index
    %c0_5 = arith.constant 0 : index
    %6 = vector.load %arg4[%c0_4, %c0_5] : memref<1x128xf32, #tpu.memory_space<vmem>>, vector<1x128xf32>
    %7 = vector.broadcast %6 : vector<1x128xf32> to vector<8x128xf32>
    %8 = arith.addf %5, %7 : vector<8x128xf32>
    %cst_6 = arith.constant 0.000000e+00 : f32
    %9 = vector.broadcast %cst_6 : f32 to vector<8x128xf32>
    %10 = arith.maximumf %8, %9 : vector<8x128xf32>
    %c0_7 = arith.constant 0 : index
    %c0_8 = arith.constant 0 : index
    %11 = vector.load %arg8[%c0_7, %c0_8] : memref<8x128xf32, #tpu.memory_space<vmem>>, vector<8x128xf32>
    %12 = arith.truncf %10 : vector<8x128xf32> to vector<8x128xbf16>
    %c0_9 = arith.constant 0 : index
    %c0_10 = arith.constant 0 : index
    %13 = vector.load %arg5[%c0_9, %c0_10] : memref<128x128xbf16, #tpu.memory_space<vmem>>, vector<128x128xbf16>
    %cst_11 = arith.constant dense<0.000000e+00> : vector<8x128xf32>
    %14 = tpu.matmul %12, %13, %cst_11 {dimension_numbers = #tpu.dot_dimension_numbers<[1], [0], [0], [1], [0, 0, 1, 1], [], []>} : vector<8x128xbf16>, vector<128x128xbf16>, vector<8x128xf32> -> vector<8x128xf32>
    %15 = arith.addf %11, %14 : vector<8x128xf32>
    %c0_12 = arith.constant 0 : index
    %c0_13 = arith.constant 0 : index
    %16 = vector.load %arg8[%c0_12, %c0_13] : memref<8x128xf32, #tpu.memory_space<vmem>>, vector<8x128xf32>
    tpu.vector_store %arg8[%c0_12, %c0_13], %15 {strides = array<i32>} : memref<8x128xf32, #tpu.memory_space<vmem>>, vector<8x128xf32>,
    %c0_i32_14 = arith.constant 0 : i32
    %17 = arith.cmpi eq, %arg1, %c0_i32_14 : i32
    %18 = arith.extui %17 : i1 to i32
    %c0_i32_15 = arith.constant 0 : i32
    %19 = arith.cmpi ne, %18, %c0_i32_15 : i32
    scf.if %19 {
      %c0_16 = arith.constant 0 : index
      %c0_17 = arith.constant 0 : index
      %20 = vector.load %arg8[%c0_16, %c0_17] : memref<8x128xf32, #tpu.memory_space<vmem>>, vector<8x128xf32>
      %c0_18 = arith.constant 0 : index
      %c0_19 = arith.constant 0 : index
      %21 = vector.load %arg6[%c0_18, %c0_19] : memref<1x128xf32, #tpu.memory_space<vmem>>, vector<1x128xf32>
      %22 = vector.broadcast %21 : vector<1x128xf32> to vector<8x128xf32>
      %23 = arith.addf %20, %22 : vector<8x128xf32>
      %cst_20 = arith.constant 0.000000e+00 : f32
      %24 = vector.broadcast %cst_20 : f32 to vector<8x128xf32>
      %25 = arith.maximumf %23, %24 : vector<8x128xf32>
      %c0_21 = arith.constant 0 : index
      %c0_22 = arith.constant 0 : index
      %26 = vector.load %arg7[%c0_21, %c0_22] : memref<8x128xf32, #tpu.memory_space<vmem>>, vector<8x128xf32>
      tpu.vector_store %arg7[%c0_21, %c0_22], %25 {strides = array<i32>} : memref<8x128xf32, #tpu.memory_space<vmem>>, vector<8x128xf32>,
    } else {
    }
    return
  }
  func.func @transform_0(%arg0: i32, %arg1: i32) -> (i32, i32) {
    %c0_i32 = arith.constant 0 : i32
    %c0_i32_0 = arith.constant 0 : i32
    return %arg0, %c0_i32 : i32, i32
  }
  func.func @transform_1(%arg0: i32, %arg1: i32) -> (i32, i32) {
    %c0_i32 = arith.constant 0 : i32
    %c0_i32_0 = arith.constant 0 : i32
    return %c0_i32, %arg1 : i32, i32
  }
  func.func @transform_2(%arg0: i32, %arg1: i32) -> (i32, i32) {
    %c0_i32 = arith.constant 0 : i32
    %c0_i32_0 = arith.constant 0 : i32
    return %c0_i32, %arg1 : i32, i32
  }
  func.func @transform_3(%arg0: i32, %arg1: i32) -> (i32, i32) {
    %c0_i32 = arith.constant 0 : i32
    %c0_i32_0 = arith.constant 0 : i32
    return %arg1, %c0_i32 : i32, i32
  }
  func.func @transform_4(%arg0: i32, %arg1: i32) -> (i32, i32) {
    %c0_i32 = arith.constant 0 : i32
    %c0_i32_0 = arith.constant 0 : i32
    %c0_i32_1 = arith.constant 0 : i32
    return %c0_i32, %c0_i32_0 : i32, i32
  }
  func.func @transform_5(%arg0: i32, %arg1: i32) -> (i32, i32) {
    %c0_i32 = arith.constant 0 : i32
    %c0_i32_0 = arith.constant 0 : i32
    return %arg0, %c0_i32 : i32, i32
  }
}

</mosaic_0001>

<bundles_post_ra>
// kernel: tpu_custom_call.1
= control target key start
LH: loop header
LB: loop body
LE: loop exit
PB: predicated region body
PF: predicated region fallthrough
CT: control target
= control target key end

     0   :  { %10 = vsyncpa [#allocation4], 0  ;;  %s1177_s0 = inlined_call_operand.hbm [shape: bf16[16,128], index: 0, kind: input, shape index: {}]   ;;  %s1178_s1 = inlined_call_operand.hbm [shape: bf16[128,128], index: 1, kind: input, shape index: {}]   ;;  %s1179_s2 = inlined_call_operand.vmem [shape: f32[1,128], index: 2, kind: input, shape index: {}]   ;;  %s1180_s3 = inlined_call_operand.hbm [shape: bf16[128,128], index: 3, kind: input, shape index: {}]   ;;  %s1181_s4 = inlined_call_operand.vmem [shape: f32[1,128], index: 4, kind: input, shape index: {}]   ;;  %s1182_s5 = inlined_call_operand.hbm [shape: f32[16,128], index: 5, kind: output, shape index: {}]  }
   0x1   :  { %12 = vsyncpa [#allocation4 + $0x1], 0 }
   0x2   :  { %13 = vsyncpa [#allocation7], 0 }
   0x3   :  { %14 = vsyncpa [#allocation5], 0 }
   0x4   :  { %16 = vsyncpa [#allocation5 + $0x1], 0  ;;  %s1023_s18 = smov 0   ;;  %s1025_s19 = smov 0  }
   0x5   :  { %s1027_s20 = smov 0   ;;  %s1029_s21 = smov 0  }
   0x6   :  { %s1031_s22 = smov 0   ;;  %s1033_s23 = smov 0  }
   0x7 LB: > { %s626_s24 = sadd.s32 4294967295, %s987_s23   ;;  %p628_p0 = scmp.ge.s32.totalorder %s987_s23, 1  ;;  %s987_s23 = sphi %s1033_s23, %s22_s23   ;;  %s983_s22 = sphi %s1031_s22, %s1192_s22   ;;  %s979_s21 = sphi %s1029_s21, %s1191_s21   ;;  %s975_s20 = sphi %s1027_s20, %s1190_s20   ;;  %s971_s19 = sphi %s1025_s19, %s1189_s19   ;;  %s967_s18 = sphi %s1023_s18, %s1188_s18  }
   0x8   : > { %p1057_p1 = scmp.eq.s32.totalorder %s626_s24, 0  ;;  %p190_p2 = scmp.lt.s32.totalorder %s987_s23, 3 }
   0x9   : > { %s203_s28 = sshll.u32 %s1178_s1, 4  ;;  %s989_s30 = smov [#allocation6]   ;;  %s204_s28 = int_to_ptr.hbm [resolvable:$true] %s203_s28 }
   0xa   : > { %p1065_p3 = pnand %p628_p0, %p190_p2  ;;  %s205_s6 = sshll.u32 %s989_s30, 4  ;;  %s206_s6 = int_to_ptr.vmem [resolvable:$true] %s205_s6 }
   0xb   : > { %p632_p6 = scmp.ge.s32.totalorder %s987_s23, 2  ;;  %s226_s9 = sshll.u32 %s1180_s3, 4  ;;  %s227_s9 = int_to_ptr.hbm [resolvable:$true] %s226_s9 }
   0xc   : > { %p736_p4 = pneg %p1065_p3  ;;  %s990_s10 = smov 64  }
   0xd   : > { %s991_s11 = smov 4   ;;  %s992_s12 = smov [#allocation8]  }
   0xe   : > { %p737_p5 = pnand %p736_p4, %p1057_p1  ;;  %s228_s13 = sshll.u32 %s992_s12, 4  ;;  %s229_s13 = int_to_ptr.vmem [resolvable:$true] %s228_s13 }
   0xf   : > { %s34_s14 = sadd.s32 1, %s983_s22  ;;  %s627_s15 = sadd.s32 4294967294, %s987_s23  }
  0x10   : > { %739 = dma.hbm_to_vmem [thread:$0]  (!%p737_p5), %s204_s28, 1024, %s206_s6, [#allocation7], %s990_s10, %s990_s10, %s991_s11  }
  0x11   : > { %742 = dma.hbm_to_vmem [thread:$0]  (!%p737_p5), %s227_s9, 1024, %s229_s13, [#allocation7], %s990_s10, %s990_s10, %s991_s11  }
  0x12   : > { %p36_p7 = scmp.ge.s32.totalorder %s34_s14, 2  ;;  %s41_s16 = sadd.s32 1, %s975_s20 }
  0x13   : > { %p48_p8 = scmp.ne.s32.totalorder %s975_s20, %s971_s19  ;;  %p49_p9 = scmp.eq.s32.totalorder %s987_s23, 0 }
  0x14   : > { %s1194_s14 = smov (%p36_p7, %s34_s14), 0  ;;  %p54_p10 = scmp.ne.s32.totalorder %s971_s19, %s967_s18 }
  0x15   : > { %s38_s17 = ssub.s32 %s983_s22, %s1194_s14  ;;  %p177_p11 = scmp.eq.s32.totalorder %s626_s24, 1 }
  0x16   : > { %p39_p12 = scmp.eq.s32.totalorder %s38_s17, 0  ;;  %p1093_p13 = por %p1057_p1, %p54_p10 }
  0x17   : > { %p1097_p0 = por %p177_p11, %p48_p8  ;;  %p183_p2 = scmp.eq.s32.totalorder %s627_s15, 1 }
  0x18   : > { %s1102_s28 = scalar_select %p39_p12, %s975_s20, %s41_s16  }
  0x19   : > { %p50_p4 = por %p49_p9, %p48_p8  ;;  %p1104_p5 = por %p183_p2, %p54_p10 }
  0x1a   : > { %s245_s6 = sand.u32 1, %s975_s20   ;;  %s634_s24 = sshll.u32 %s983_s22, 2 }
  0x1b   : > { %p753_p7 = scmp.lt.s32.totalorder %s987_s23, 2  ;;  %s633_s7 = sshll.u32 %s245_s6, 2 }
  0x1c   : > { %s253_s10 = scalar_lea.hbm %s1177_s0, %s634_s24  ;;  %s249_s12 = scalar_lea.vmem [#allocation3], %s633_s7 }
  0x1d   : > { %s255_s11 = sshll.u32 %s253_s10, 4  ;;  %s257_s13 = sshll.u32 %s249_s12, 4  ;;  %s256_s11 = int_to_ptr.hbm [resolvable:$true] %s255_s11  ;;  %s258_s13 = int_to_ptr.vmem [resolvable:$true] %s257_s13 }
  0x1e   : > { %p744_p11 = pnand %p753_p7, %p50_p4  ;;  %s246_s15 = scalar_lea.sflag [#allocation4], %s245_s6 }
  0x1f   : > { %266 = sbr.rel (%p1065_p3) target bundleno = 337 (0x151), region = 40  ;;  %s1117_s16 = sand.u32 (!%p1065_p3), 1, %s971_s19  }
  0x20   : > { %746 = dma.hbm_to_vmem [thread:$0]  (!%p744_p11), %s256_s11, 64, %s258_s13, %s246_s15  }
  0x21   : > { %s636_s17 = sshll.u32 (!%p1065_p3), %s1117_s16, 2  ;;  %s269_s8 = scalar_lea.sflag (!%p1065_p3), [#allocation4], %s1117_s16 }
  0x22   : > { %s1121_s24 = scalar_lea.vmem (!%p1065_p3), [#allocation3], %s636_s17 }
  0x24   : > { %954 = dma.done.wait (%p1093_p13), %s269_s8, 64  }
  0x25   : > { %956 = vsyncadd (%p1093_p13), %s269_s8, 4294967232 }
  0x26   : > { %958 = dma.done.wait (%p1057_p1), [#allocation7], 2048  }
  0x27   : > { %960 = vsyncadd (%p1057_p1), [#allocation7], 4294965248  ;;  %v715_v0 = vld [vmem:[#allocation6 + $0x38] sm:$0xff]  ;;  %v714_v1 = vld [vmem:[#allocation6 + $0x30] sm:$0xff]  ;;  %s639_s26 = sshll.u32 %s1117_s16, 3  ;;  %s705_s6 = sshll.u32 %s979_s21, 3 }
  0x28   : > { %391 = vmatpush.bf16.msra.mxu0 %v715_v0  ;;  %v723_v2 = vld [vmem:[#allocation8 + $0x38] sm:$0xff]  ;;  %v722_v3 = vld [vmem:[#allocation8 + $0x30] sm:$0xff]  ;;  %v713_v4 = vld [vmem:[#allocation6 + $0x28] sm:$0xff]  ;;  %s508_s12 = scalar_lea.hbm %s1182_s5, %s705_s6  ;;  %s312_s13 = scalar_lea.vmem [#allocation9], %s639_s26 }
  0x29   : > { %471 = vmatpush.bf16.msra.mxu1 %v723_v2  ;;  %v721_v5 = vld [vmem:[#allocation8 + $0x28] sm:$0xff]  ;;  %v712_v6 = vld [vmem:[#allocation6 + $0x20] sm:$0xff]  ;;  %v711_v8 = vld [vmem:[#allocation6 + $0x18] sm:$0xff]  ;;  %s510_s15 = sshll.u32 %s312_s13, 4  ;;  %s512_s17 = sshll.u32 %s508_s12, 4  ;;  %s511_s15 = int_to_ptr.vmem [resolvable:$true] %s510_s15  ;;  %s513_s17 = int_to_ptr.hbm [resolvable:$true] %s512_s17 }
  0x2a   : > { %v720_v7 = vld [vmem:[#allocation8 + $0x20] sm:$0xff]  ;;  %v719_v9 = vld [vmem:[#allocation8 + $0x18] sm:$0xff]  ;;  %v710_v10 = vld [vmem:[#allocation6 + $0x10] sm:$0xff]  ;;  %s498_s8 = scalar_lea.sflag [#allocation5], %s1117_s16  ;;  %s915_s21 = sshra.s32 %s513_s17, 4  ;;  %s916_s21 = int_to_ptr.hbm [resolvable:$true] %s915_s21 }
  0x2b   : > { %v718_v11 = vld [vmem:[#allocation8 + $0x10] sm:$0xff]  ;;  %v709_v12 = vld [vmem:[#allocation6 + $0x8] sm:$0xff]  ;;  %v708_v13 = vld [vmem:[#allocation6] sm:$0xff]  ;;  %s921_s6 = scalar_lea.hbm %s1182_s5, 16  ;;  %p922_p9 = scmp.lt.s32.totalorder %s916_s21, %s1182_s5 }
  0x2c   : > { %392 = vmatpush.bf16.msra.mxu0 %v714_v1  ;;  %v322_v14 = vld [vmem:[%s1121_s24] sm:$0xf]  ;;  %v717_v15 = vld [vmem:[#allocation8 + $0x8] sm:$0xff]  ;;  %v716_v16 = vld [vmem:[#allocation8] sm:$0xff]  ;;  %s917_s24 = scalar_lea.hbm %s916_s21, 8 }
  0x2d   : > { %472 = vmatpush.bf16.msra.mxu1 %v722_v3  ;;  %v809_v17 = vld [vmem:[%s1179_s2] ss:$0 sm:$0xff]  ;;  %p918_p1 = scmp.ne.s32.totalorder %s916_s21, %s917_s24  ;;  %p923_p10 = scmp.lt.s32.totalorder %s921_s6, %s917_s24 }
  0x2e   : > { %v810_v23 = vld [vmem:[%s1181_s4] ss:$0 sm:$0xff] }
  0x2f   : > { %p919_p3 = pnand %p918_p1, %p1097_p0  ;;  %p924_p12 = por %p923_p10, %p922_p9 }
  0x30   : > { %393 = vmatpush.bf16.msra.mxu0 %v713_v4 }
  0x31   : > { %473 = vmatpush.bf16.msra.mxu1 %v721_v5  ;;  %p920_p8 = pneg %p919_p3 }
  0x33   : > { %p925_p13 = pnand %p924_p12, %p920_p8 }
  0x34   : > { %394 = vmatpush.bf16.msra.mxu0 %v712_v6 }
  0x35   : > { %474 = vmatpush.bf16.msra.mxu1 %v720_v7 }
  0x38   : > { %395 = vmatpush.bf16.msra.mxu0 %v711_v8 }
  0x39   : > { %475 = vmatpush.bf16.msra.mxu1 %v719_v9 }
  0x3c   : > { %396 = vmatpush.bf16.msra.mxu0 %v710_v10 }
  0x3d   : > { %476 = vmatpush.bf16.msra.mxu1 %v718_v11 }
  0x40   : > { %397 = vmatpush.bf16.msra.mxu0 %v709_v12 }
  0x41   : > { %477 = vmatpush.bf16.msra.mxu1 %v717_v15 }
  0x44   : > { %398 = vmatpush.bf16.msra.mxu0 %v708_v13 }
  0x45   : > { %478 = vmatpush.bf16.msra.mxu1 %v716_v16 }
  0x47   : > { %399 = vmatmul.bf16.vlgmr.msra.gmra.mxu0 %v322_v14 }
  0xc4   : > { %v400_v18 = vpop.f32.mrf.mxu0 }
  0xc5   : > { %v401_v19 = vadd.f32 %v809_v17, %v400_v18 }
  0xc7   : > { %v404_v20 = vmax.f32 %v401_v19, 0.0 }
  0xc9   : > { %v406_v21 = vpack.c.bf16 %v404_v20, %v404_v20 }
  0xcb   : > { %479 = vmatmul.bf16.vlgmr.msra.gmra.mxu1 %v406_v21 }
  0xcc   : > { %v402_v22 = vpop.f32.mrf.mxu0 }
 0x148   : > { %v480_v24 = vpop.f32.mrf.mxu1 }
 0x149   : > { %v494_v25 = vadd.f32 %v810_v23, %v480_v24 }
 0x14b   : > { %v495_v26 = vmax.f32 %v494_v25, 0.0 }
 0x14d   : > { %496 = vst [vmem:[%s312_s13] sm:$0xff] %v495_v26 }
 0x14e   : > { %928 = shalt.err (!%p925_p13)
}
 0x14f   : > { %734 = dma.vmem_to_hbm [thread:$0]  (%p1097_p0), %s511_s15, 128, %s513_s17, %s498_s8  }
 0x150   : > { %v482_v27 = vpop.f32.mrf.mxu1 }
 0x151 PF: > { %s524_s16 = sand.u32 1, %s967_s18   ;;  %p748_p2 = pnand %p632_p6, %p1104_p5 }
 0x152   : > { %s525_s9 = scalar_lea.sflag [#allocation5], %s524_s16 }
 0x153   : > { %p749_p4 = pneg %p748_p2 }
 0x155   : > { %962 = dma.done.wait (%p749_p4), %s525_s9, 128  }
 0x156   : > { %964 = vsyncadd (%p749_p4), %s525_s9, 4294967168  ;;  %s22_s23 = sadd.s32 1, %s987_s23   ;;  %s1188_s18 = smov %s971_s19 }
 0x157   : > { %p19_p7 = scmp.ge.s32.totalorder %s22_s23, 4   ;;  %s1189_s19 = smov %s975_s20 }
 0x158   : > { %s1190_s20 = smov %s1102_s28  ;;  %s1191_s21 = smov %s983_s22 }
 0x159   : > { %s1192_s22 = smov %s1194_s14  ;;  %21 = sbr.rel (!%p19_p7) target bundleno = 7 (0x7), region = 106 }
 0x15e   :  { %531 = vsyncpa [#allocation4], 1 }
 0x15f   :  { %533 = vsyncpa [#allocation4 + $0x1], 1 }
 0x160   :  { %534 = vsyncpa [#allocation7], 1 }
 0x161   :  { %535 = vsyncpa [#allocation5], 1 }
 0x162   :  { %537 = vsyncpa [#allocation5 + $0x1], 1 }

</bundles_post_ra>
